<compile_context>
chip_gen: v7x
topology: tpu7x:2x2x1
jax: 0.10.0
libtpu: 0.0.40
codegen_flags: <defaults>
</compile_context>

<pallas_src>
import functools

import jax
import jax.numpy as jnp
from jax.experimental import pallas as pl
from jax.experimental.pallas import tpu as pltpu


def _srp_shuffle_kernel(x_ref, p_ref, o_ref, *, scale):
    # x_ref: (tm, scale, tl)   p_ref: (scale, tl, tn)   o_ref: (tm, tn)
    out = None
    for s in range(scale):  # static unroll; `scale` is a small Python int
        part = jnp.dot(
            x_ref[:, s, :],               # (tm, tl)
            p_ref[s],                     # (tl, tn); P[s][l, l*scale + s] = 1
            preferred_element_type=jnp.float32,
            precision=jax.lax.Precision.HIGHEST,   # exact 1.0 * x for f32
        )
        out = part if out is None else out + part  # disjoint columns -> exact
    o_ref[...] = out.astype(o_ref.dtype)


def _pick_length_tile(L):
    """Length-axis tile: full L when small, else a multiple of 128 dividing L."""
    if L <= 256:
        return L
    for tl in (256, 128):
        if L % tl == 0:
            return tl
    # TODO(synk): lengths > 256 not divisible by 128 fall back to an untiled
    # length axis (perm grows as (scale*L)^2); pad L upstream for such shapes.
    return L


def srp_shuffle(x, scale, *, tm=512):
    """SRPShuffle.forward: (B, C, L) -> (B, C // scale, scale * L)."""
    B, C, L = x.shape
    if C % scale != 0:
        raise ValueError("Check input channels")
    out_C = C // scale
    M = B * out_C
    N = scale * L

    tl = _pick_length_tile(L)
    tn = scale * tl
    tm = min(tm, M)

    # Contiguous (bitcast) reshape: row m = (b, out_c); trailing dims (s, l).
    x3 = x.reshape(M, scale, L)

    # Host-precomputed 0/1 permutation, identical for every length tile:
    #   perm[s, l, l*scale + s] = 1
    # TODO(synk): integer inputs should use a non-MXU interleave path instead
    # of this permutation matmul (v7x MXU has no integer mode).
    l_idx = jnp.arange(tl, dtype=jnp.int32)[None, :, None]
    s_idx = jnp.arange(scale, dtype=jnp.int32)[:, None, None]
    col = jnp.arange(tn, dtype=jnp.int32)[None, None, :]
    perm = (col == l_idx * scale + s_idx).astype(x.dtype)     # (scale, tl, tn)

    kernel = functools.partial(_srp_shuffle_kernel, scale=scale)
    out2 = pl.pallas_call(
        kernel,
        out_shape=jax.ShapeDtypeStruct((M, N), x.dtype),
        grid=(pl.cdiv(M, tm), pl.cdiv(L, tl)),
        in_specs=[
            # Row tile i, all `scale` phases, length tile j.
            pl.BlockSpec((tm, scale, tl), lambda i, j: (i, 0, j)),
            # Constant index_map: perm is DMA'd once and stays resident.
            pl.BlockSpec((scale, tl, tn), lambda i, j: (0, 0, 0)),
        ],
        out_specs=pl.BlockSpec((tm, tn), lambda i, j: (i, j)),
        compiler_params=pltpu.CompilerParams(
            dimension_semantics=("parallel", "parallel"),
            vmem_limit_bytes=32 * 1024 * 1024,
        ),
    )(x3, perm)

    # Contiguous (bitcast) reshape back to NCL.
    return out2.reshape(B, out_C, N)


if __name__ == "__main__":
    key = jax.random.PRNGKey(0)
    B, C, L, scale = 2, 8, 32, 4          # output (2, 2, 128): lane-dense
    x = jax.random.normal(key, (B, C, L), dtype=jnp.float32)

    out = jax.block_until_ready(srp_shuffle(x, scale))

    # Pure-JAX reference of SRPShuffle.forward
    out_C = C // scale
    ref = x.reshape(B, out_C, scale, L).transpose(0, 1, 3, 2).reshape(B, out_C, scale * L)

    assert out.shape == (B, out_C, scale * L), out.shape
    assert bool(jnp.array_equal(out, ref)), "mismatch vs SRPShuffle reference"
    print("KERNEL_OK")
</pallas_src>

<mosaic_0001>
module attributes {stable_mosaic.version = 11 : i64} {
  func.func @_srp_shuffle_kernel(%arg0: i32, %arg1: i32, %arg2: memref<4x4x32xf32, #tpu.memory_space<vmem>>, %arg3: memref<4x32x128xf32, #tpu.memory_space<vmem>>, %arg4: memref<4x128xf32, #tpu.memory_space<vmem>>) attributes {dimension_semantics = [#tpu.dimension_semantics<parallel>, #tpu.dimension_semantics<parallel>], iteration_bounds = array<i64: 1, 1>, scalar_prefetch = 0 : i64, scratch_operands = 0 : i64, tpu.core_type = #tpu.core_type<tc>, window_params = [{transform_indices = @transform_0, window_bounds = array<i64: 4, 4, 32>}, {pipeline_mode = #tpu.pipeline_mode<synchronous>, transform_indices = @transform_1, window_bounds = array<i64: 4, 32, 128>}, {transform_indices = @transform_2, window_bounds = array<i64: 4, 128>}]} {
    %c0 = arith.constant 0 : index
    %c0_0 = arith.constant 0 : index
    %c0_1 = arith.constant 0 : index
    %0 = vector.load %arg2[%c0, %c0_0, %c0_1] : memref<4x4x32xf32, #tpu.memory_space<vmem>>, vector<4x1x32xf32>
    %1 = vector.shape_cast %0 : vector<4x1x32xf32> to vector<4x32xf32>
    %c0_2 = arith.constant 0 : index
    %c0_3 = arith.constant 0 : index
    %c0_4 = arith.constant 0 : index
    %2 = vector.load %arg3[%c0_2, %c0_3, %c0_4] : memref<4x32x128xf32, #tpu.memory_space<vmem>>, vector<1x32x128xf32>
    %3 = vector.shape_cast %2 : vector<1x32x128xf32> to vector<32x128xf32>
    %cst = arith.constant dense<0.000000e+00> : vector<4x128xf32>
    %4 = tpu.matmul %1, %3, %cst {dimension_numbers = #tpu.dot_dimension_numbers<[1], [0], [0], [1], [0, 0, 1, 1], [], []>, precision = #tpu.contract_precision<fp32>} : vector<4x32xf32>, vector<32x128xf32>, vector<4x128xf32> -> vector<4x128xf32>
    %c0_5 = arith.constant 0 : index
    %c1 = arith.constant 1 : index
    %c0_6 = arith.constant 0 : index
    %5 = vector.load %arg2[%c0_5, %c1, %c0_6] : memref<4x4x32xf32, #tpu.memory_space<vmem>>, vector<4x1x32xf32>
    %6 = vector.shape_cast %5 : vector<4x1x32xf32> to vector<4x32xf32>
    %c1_7 = arith.constant 1 : index
    %c0_8 = arith.constant 0 : index
    %c0_9 = arith.constant 0 : index
    %7 = vector.load %arg3[%c1_7, %c0_8, %c0_9] : memref<4x32x128xf32, #tpu.memory_space<vmem>>, vector<1x32x128xf32>
    %8 = vector.shape_cast %7 : vector<1x32x128xf32> to vector<32x128xf32>
    %cst_10 = arith.constant dense<0.000000e+00> : vector<4x128xf32>
    %9 = tpu.matmul %6, %8, %cst_10 {dimension_numbers = #tpu.dot_dimension_numbers<[1], [0], [0], [1], [0, 0, 1, 1], [], []>, precision = #tpu.contract_precision<fp32>} : vector<4x32xf32>, vector<32x128xf32>, vector<4x128xf32> -> vector<4x128xf32>
    %10 = arith.addf %4, %9 : vector<4x128xf32>
    %c0_11 = arith.constant 0 : index
    %c2 = arith.constant 2 : index
    %c0_12 = arith.constant 0 : index
    %11 = vector.load %arg2[%c0_11, %c2, %c0_12] : memref<4x4x32xf32, #tpu.memory_space<vmem>>, vector<4x1x32xf32>
    %12 = vector.shape_cast %11 : vector<4x1x32xf32> to vector<4x32xf32>
    %c2_13 = arith.constant 2 : index
    %c0_14 = arith.constant 0 : index
    %c0_15 = arith.constant 0 : index
    %13 = vector.load %arg3[%c2_13, %c0_14, %c0_15] : memref<4x32x128xf32, #tpu.memory_space<vmem>>, vector<1x32x128xf32>
    %14 = vector.shape_cast %13 : vector<1x32x128xf32> to vector<32x128xf32>
    %cst_16 = arith.constant dense<0.000000e+00> : vector<4x128xf32>
    %15 = tpu.matmul %12, %14, %cst_16 {dimension_numbers = #tpu.dot_dimension_numbers<[1], [0], [0], [1], [0, 0, 1, 1], [], []>, precision = #tpu.contract_precision<fp32>} : vector<4x32xf32>, vector<32x128xf32>, vector<4x128xf32> -> vector<4x128xf32>
    %16 = arith.addf %10, %15 : vector<4x128xf32>
    %c0_17 = arith.constant 0 : index
    %c3 = arith.constant 3 : index
    %c0_18 = arith.constant 0 : index
    %17 = vector.load %arg2[%c0_17, %c3, %c0_18] : memref<4x4x32xf32, #tpu.memory_space<vmem>>, vector<4x1x32xf32>
    %18 = vector.shape_cast %17 : vector<4x1x32xf32> to vector<4x32xf32>
    %c3_19 = arith.constant 3 : index
    %c0_20 = arith.constant 0 : index
    %c0_21 = arith.constant 0 : index
    %19 = vector.load %arg3[%c3_19, %c0_20, %c0_21] : memref<4x32x128xf32, #tpu.memory_space<vmem>>, vector<1x32x128xf32>
    %20 = vector.shape_cast %19 : vector<1x32x128xf32> to vector<32x128xf32>
    %cst_22 = arith.constant dense<0.000000e+00> : vector<4x128xf32>
    %21 = tpu.matmul %18, %20, %cst_22 {dimension_numbers = #tpu.dot_dimension_numbers<[1], [0], [0], [1], [0, 0, 1, 1], [], []>, precision = #tpu.contract_precision<fp32>} : vector<4x32xf32>, vector<32x128xf32>, vector<4x128xf32> -> vector<4x128xf32>
    %22 = arith.addf %16, %21 : vector<4x128xf32>
    %c0_23 = arith.constant 0 : index
    %c0_24 = arith.constant 0 : index
    %23 = vector.load %arg4[%c0_23, %c0_24] : memref<4x128xf32, #tpu.memory_space<vmem>>, vector<4x128xf32>
    tpu.vector_store %arg4[%c0_23, %c0_24], %22 {strides = array<i32>} : memref<4x128xf32, #tpu.memory_space<vmem>>, vector<4x128xf32>,
    return
  }
  func.func @transform_0(%arg0: i32, %arg1: i32) -> (i32, i32, i32) {
    %c0_i32 = arith.constant 0 : i32
    %c0_i32_0 = arith.constant 0 : i32
    return %arg0, %c0_i32, %arg1 : i32, i32, i32
  }
  func.func @transform_1(%arg0: i32, %arg1: i32) -> (i32, i32, i32) {
    %c0_i32 = arith.constant 0 : i32
    %c0_i32_0 = arith.constant 0 : i32
    %c0_i32_1 = arith.constant 0 : i32
    %c0_i32_2 = arith.constant 0 : i32
    return %c0_i32, %c0_i32_0, %c0_i32_1 : i32, i32, i32
  }
  func.func @transform_2(%arg0: i32, %arg1: i32) -> (i32, i32) {
    %c0_i32 = arith.constant 0 : i32
    return %arg0, %arg1 : i32, i32
  }
}

</mosaic_0001>

<bundles_post_ra>
// kernel: tpu_custom_call.1
= control target key start
LH: loop header
LB: loop body
LE: loop exit
PB: predicated region body
PF: predicated region fallthrough
CT: control target
= control target key end

     0   :  { %7 = vsyncpa [#allocation3], 0  ;;  %s3162_s0 = inlined_call_operand.hbm [shape: f32[4,4,32], index: 0, kind: input, shape index: {}]   ;;  %s3163_s1 = inlined_call_operand.hbm [shape: f32[4,32,128], index: 1, kind: input, shape index: {}]   ;;  %s3164_s2 = inlined_call_operand.hbm [shape: f32[4,128], index: 2, kind: output, shape index: {}]  }
   0x1   :  { %8 = vsyncpa [#allocation6], 0 }
   0x2   :  { %9 = vsyncpa [#allocation4], 0  ;;  %s2741_s9 = smov [#allocation2]   ;;  %s2669_s13 = scalar_lea.hbm %s3162_s0, 256 }
   0x3   :  { %s15_s10 = sshll.u32 %s2741_s9, 4  ;;  %p2670_p0 = scmp.ne.s32.totalorder %s3162_s0, %s2669_s13  ;;  %s16_s10 = int_to_ptr.vmem [resolvable:$true] %s15_s10 }
   0x4   :  { %p2673_p1 = scmp.lt.u32.totalorder %s2669_s13, %s3162_s0 }
   0x6   :  { %p2675_p2 = pnand %p2673_p1, %p2670_p0 }
   0x8   :  { %2678 = shalt.err (!%p2675_p2)
}
   0x9   :  { %s2679_s18 = scalar_lea.vmem %s16_s10, 256  ;;  %p2684_p4 = scmp.lt.s32.totalorder %s16_s10, %s16_s10 }
   0xa   :  { %p2680_p3 = scmp.ne.s32.totalorder %s16_s10, %s2679_s18  ;;  %p2685_p5 = scmp.lt.s32.totalorder %s2679_s18, %s2679_s18 }
   0xc   :  { %p2686_p6 = por %p2685_p5, %p2684_p4 }
   0xe   :  { %p2687_p7 = pnand %p2686_p6, %p2680_p3 }
  0x10   :  { %2690 = shalt.err (!%p2687_p7)
}
  0x11   :  { %s2742_s19 = smov 64   ;;  %s2743_s20 = smov 4  }
  0x12   :  { %21 = dma.hbm_to_vmem [thread:$0]  %s3162_s0, 256, %s16_s10, [#allocation3], %s2742_s19, %s2742_s19, %s2743_s20  }
  0x13   :  { %s2744_s23 = smov [#allocation5]   ;;  %s2691_s27 = scalar_lea.hbm %s3163_s1, 2048 }
  0x14   :  { %s27_s24 = sshll.u32 %s2744_s23, 4  ;;  %p2692_p8 = scmp.ne.s32.totalorder %s3163_s1, %s2691_s27  ;;  %s28_s24 = int_to_ptr.vmem [resolvable:$true] %s27_s24 }
  0x15   :  { %p2695_p9 = scmp.lt.u32.totalorder %s2691_s27, %s3163_s1 }
  0x17   :  { %p2697_p10 = pnand %p2695_p9, %p2692_p8 }
  0x19   :  { %2700 = shalt.err (!%p2697_p10)
}
  0x1a   :  { %s2701_s4 = scalar_lea.vmem %s28_s24, 2048  ;;  %p2706_p12 = scmp.lt.s32.totalorder %s28_s24, %s28_s24 }
  0x1b   :  { %p2702_p11 = scmp.ne.s32.totalorder %s28_s24, %s2701_s4  ;;  %p2707_p13 = scmp.lt.s32.totalorder %s2701_s4, %s2701_s4 }
  0x1d   :  { %p2708_p0 = por %p2707_p13, %p2706_p12 }
  0x1f   :  { %p2709_p1 = pnand %p2708_p0, %p2702_p11 }
  0x21   :  { %2712 = shalt.err (!%p2709_p1)
}
  0x22   :  { %s2745_s0 = smov 128   ;;  %s2746_s5 = smov 8  }
  0x23   :  { %33 = dma.hbm_to_vmem [thread:$0]  %s3163_s1, 2048, %s28_s24, [#allocation6], %s2745_s0, %s2745_s0, %s2746_s5  }
  0x24   :  { %2735 = dma.done.wait [#allocation3], 256  }
  0x25   :  { %2736 = vsyncadd [#allocation3], 4294967040 }
  0x26   :  { %2737 = dma.done.wait [#allocation6], 2048  }
  0x27   :  { %2738 = vsyncadd [#allocation6], 4294965248  ;;  %v2747_v0 = vmov 0.0|0.0   ;;  %vm2748_vm0 = vmmov 0   ;;  %v2749_v1 = vmov 0.0   ;;  %v53_v2 = vld [vmem:[#allocation5 + $0x20] sm:$0xff] }
  0x28   :  { %2470 = vmatprep.subr.bf16.mxu1 %v2747_v0  ;;  %2542 = vmatprep.subr.bf16.mxu0 %v2747_v0  ;;  %v54_v3 = vld [vmem:[#allocation5 + $0x28] sm:$0xff]  ;;  %v1060_v4 = vld [vmem:[#allocation5 + $0x40] sm:$0xff]  ;;  %vm62_vm1 = vcmask 1041409   ;;  %vm65_vm2 = vcmask 1042434   ;;  %v74_v5 = vand.u32 4294901760, %v53_v2  ;;  %v55_v9 = vld [vmem:[#allocation5 + $0x30] sm:$0xff] }
  0x29   :  { %2214 = vmatprep.mubr.msk.f32.mxu1 %vm2748_vm0, %v2749_v1  ;;  %2346 = vmatprep.mubr.msk.f32.mxu0 %vm2748_vm0, %v2749_v1  ;;  %v77_v6 = vand.u32 4294901760, %v54_v3  ;;  %v1061_v7 = vld [vmem:[#allocation5 + $0x48] sm:$0xff]  ;;  %v1077_v8 = vand.u32 4294901760, %v1060_v4  ;;  %v56_v10 = vld [vmem:[#allocation5 + $0x38] sm:$0xff]  ;;  %v80_v12 = vand.u32 4294901760, %v55_v9  ;;  %v1062_v14 = vld [vmem:[#allocation5 + $0x50] sm:$0xff] }
  0x2a   :  { %v1080_v11 = vand.u32 4294901760, %v1061_v7  ;;  %v83_v13 = vand.u32 4294901760, %v56_v10  ;;  %v1063_v15 = vld [vmem:[#allocation5 + $0x58] sm:$0xff]  ;;  %vm68_vm3 = vcmask 1043459   ;;  %v2798_v17 = vsub.f32 %v53_v2, %v74_v5  ;;  %v49_v19 = vld [vmem:[#allocation2 + $0x5] sm:$0x1] }
  0x2b   :  { %v2796_v16 = vpack.c.bf16 %v77_v6, %v74_v5  ;;  %v2800_v18 = vsub.f32 %v54_v3, %v77_v6  ;;  %v50_v20 = vld [vmem:[#allocation2 + $0x9] sm:$0x1]  ;;  %vm70_vm4 = vcmask 261120   ;;  %v2804_v22 = vsub.f32 %v1060_v4, %v1077_v8  ;;  %v48_v24 = vld [vmem:[#allocation2 + $0x1] sm:$0x1]  ;;  %s2750_s1 = smov [#allocation7]  }
  0x2c   :  { %v2802_v21 = vpack.c.bf16 %v1080_v11, %v1077_v8  ;;  %v2806_v23 = vsub.f32 %v1061_v7, %v1080_v11  ;;  %v51_v25 = vld [vmem:[#allocation2 + $0xd] sm:$0x1]  ;;  %v1056_v26 = vld [vmem:[#allocation2 + $0x6] sm:$0x1]  ;;  %v2809_v27 = vpack.c.bf16 %v83_v13, %v80_v12  ;;  %v1083_v28 = vand.u32 4294901760, %v1062_v14  ;;  %s2076_s8 = sshll.u32 %s2750_s1, 4  ;;  %s2077_s8 = int_to_ptr.vmem [resolvable:$true] %s2076_s8 }
  0x2d   :  { %2472 = vmatpush3.bf16.msra.mxu1 %v2796_v16  ;;  %v1086_v29 = vand.u32 4294901760, %v1063_v15  ;;  %v61_v30 = vrot.slane %v49_v19, 7  ;;  %v1057_v31 = vld [vmem:[#allocation2 + $0xa] sm:$0x1]  ;;  %v64_v32 = vrot.slane %v50_v20, 6  ;;  %v67_v33 = vrot.slane %v51_v25, 5  ;;  %p2718_p3 = scmp.lt.s32.totalorder %s2077_s8, %s2077_s8 }
  0x2e   :  { %2544 = vmatpush3.bf16.msra.mxu0 %v2802_v21  ;;  %2473 = vmatprep.subr.bf16.mxu1 %v2747_v0  ;;  %v155_v34 = vand.u32 4294901760, %v2798_v17  ;;  %v162_v35 = vand.u32 4294901760, %v2800_v18  ;;  %v1058_v36 = vld [vmem:[#allocation2 + $0xe] sm:$0x1]  ;;  %v2816_v37 = vsub.f32 %v55_v9, %v80_v12  ;;  %v2818_v38 = vsub.f32 %v56_v10, %v83_v13  ;;  %v1055_v41 = vld [vmem:[#allocation2 + $0x2] sm:$0x1] }
  0x2f   :  { %2545 = vmatprep.subr.bf16.mxu0 %v2747_v0  ;;  %v2820_v39 = vpack.c.bf16 %v1086_v29, %v1083_v28  ;;  %v63_v40 = vsel %vm62_vm1, %v61_v30, %v48_v24  ;;  %v1068_v45 = vrot.slane %v1056_v26, 7  ;;  %v1070_v47 = vrot.slane %v1057_v31, 6  ;;  %s2713_s9 = scalar_lea.vmem %s2077_s8, 64 }
  0x30   :  { %v66_v42 = vsel %vm65_vm2, %v64_v32, %v63_v40  ;;  %v156_v43 = vsub.f32 %v2798_v17, %v155_v34  ;;  %v163_v44 = vsub.f32 %v2800_v18, %v162_v35  ;;  %v1072_v48 = vrot.slane %v1058_v36, 5  ;;  %p2714_p2 = scmp.ne.s32.totalorder %s2077_s8, %s2713_s9  ;;  %p2719_p4 = scmp.lt.s32.totalorder %s2713_s9, %s2713_s9 }
  0x31   :  { %2475 = vmatpush3.bf16.msra.mxu1 %v2809_v27  ;;  %v69_v46 = vsel %vm68_vm3, %v67_v33, %v66_v42  ;;  %v1158_v49 = vand.u32 4294901760, %v2804_v22  ;;  %v2834_v50 = vsub.f32 %v1062_v14, %v1083_v28  ;;  %v2836_v51 = vsub.f32 %v1063_v15, %v1086_v29 }
  0x32   :  { %2547 = vmatpush3.bf16.msra.mxu0 %v2820_v39  ;;  %2476 = vmatprep.subr.bf16.mxu1 %v2747_v0  ;;  %v71_v52 = vsel %vm70_vm4, %v69_v46, 0  ;;  %v1069_v53 = vsel %vm62_vm1, %v1068_v45, %v1055_v41  ;;  %v157_v55 = vand.u32 4294901760, %v156_v43  ;;  %v1165_v57 = vand.u32 4294901760, %v2806_v23  ;;  %v41_v43 = vld [vmem:[#allocation2 + $0x4] sm:$0x1]  ;;  %p2720_p5 = por %p2719_p4, %p2718_p3 }
  0x33   :  { %2548 = vmatprep.subr.bf16.mxu0 %v2747_v0  ;;  %v2842_v54 = vand.u32 4294901760, %v71_v52  ;;  %v1071_v56 = vsel %vm65_vm2, %v1070_v47, %v1069_v53  ;;  %v1159_v59 = vsub.f32 %v2804_v22, %v1158_v49  ;;  %v169_v60 = vand.u32 4294901760, %v2816_v37  ;;  %v42_v45 = vld [vmem:[#allocation2 + $0x8] sm:$0x1]  ;;  %v1563_v47 = vld [vmem:[#allocation2 + $0x7] sm:$0x1] }
  0x34   :  { %v1073_v58 = vsel %vm68_vm3, %v1072_v48, %v1071_v56  ;;  %v176_v61 = vand.u32 4294901760, %v2818_v38  ;;  %v164_v63 = vand.u32 4294901760, %v163_v44  ;;  %v1166_v3 = vsub.f32 %v2806_v23, %v1165_v57  ;;  %v40_v48 = vld [vmem:[#allocation2] sm:$0x1]  ;;  %p2721_p6 = pnand %p2720_p5, %p2714_p2 }
  0x35   :  { %v2853_v62 = vsub.f32 %v71_v52, %v2842_v54  ;;  %v1074_v2 = vsel %vm70_vm4, %v1073_v58, 0  ;;  %v170_v5 = vsub.f32 %v2816_v37, %v169_v60  ;;  %v1172_v7 = vand.u32 4294901760, %v2834_v50  ;;  %v43_v52 = vld [vmem:[#allocation2 + $0xc] sm:$0x1] }
  0x36   :  { %v2859_v4 = vand.u32 4294901760, %v1074_v2  ;;  %v177_v6 = vsub.f32 %v2818_v38, %v176_v61  ;;  %v1179_v9 = vand.u32 4294901760, %v2836_v51  ;;  %v1160_v11 = vand.u32 4294901760, %v1159_v59  ;;  %v1562_v59 = vld [vmem:[#allocation2 + $0x3] sm:$0x1] }
  0x37   :  { %v144_v8 = vand.u32 4294901760, %v2853_v62  ;;  %v1167_v13 = vand.u32 4294901760, %v1166_v3  ;;  %v1173_v14 = vsub.f32 %v2834_v50, %v1172_v7  ;;  %v2477_v19 = vpack.c.bf16 %v164_v63, %v157_v55  ;;  %v1564_v55 = vld [vmem:[#allocation2 + $0xb] sm:$0x1] }
  0x38   :  { %v2871_v10 = vsub.f32 %v1074_v2, %v2859_v4  ;;  %v1180_v15 = vsub.f32 %v2836_v51, %v1179_v9  ;;  %v171_v24 = vand.u32 4294901760, %v170_v5  ;;  %v178_v25 = vand.u32 4294901760, %v177_v6  ;;  %v1565_v2 = vld [vmem:[#allocation2 + $0xf] sm:$0x1] }
  0x39   :  { %v145_v12 = vsub.f32 %v2853_v62, %v144_v8  ;;  %v2549_v29 = vpack.c.bf16 %v1167_v13, %v1160_v11  ;;  %v1174_v30 = vand.u32 4294901760, %v1173_v14  ;;  %v2483_v40 = vpack.c.bf16 %v2800_v18, %v2798_v17  ;;  %v44_v13 = vld [vmem:[#allocation5] sm:$0xff]  ;;  %v45_v14 = vld [vmem:[#allocation5 + $0x8] sm:$0xff] }
  0x3a   :  { %v1147_v20 = vand.u32 4294901760, %v2871_v10  ;;  %v1181_v31 = vand.u32 4294901760, %v1180_v15  ;;  %v2480_v33 = vpack.c.bf16 %v178_v25, %v171_v24  ;;  %v2555_v41 = vpack.c.bf16 %v2806_v23, %v2804_v22  ;;  %v1568_v25 = vld [vmem:[#allocation5 + $0x68] sm:$0xff]  ;;  %v46_v23 = vld [vmem:[#allocation5 + $0x10] sm:$0xff] }
  0x3b   :  { %v146_v26 = vand.u32 4294901760, %v145_v12  ;;  %v2486_v42 = vpack.c.bf16 %v2818_v38, %v2816_v37  ;;  %v2558_v44 = vpack.c.bf16 %v2836_v51, %v2834_v50  ;;  %v562_v46 = vrot.slane %v41_v43, 7  ;;  %v47_v37 = vld [vmem:[#allocation5 + $0x18] sm:$0xff] }
  0x3c   :  { %v1148_v28 = vsub.f32 %v2871_v10, %v1147_v20  ;;  %v2552_v36 = vpack.c.bf16 %v1181_v31, %v1174_v30  ;;  %v564_v53 = vrot.slane %v42_v45, 6  ;;  %v1575_v56 = vrot.slane %v1563_v47, 7  ;;  %v1570_v51 = vld [vmem:[#allocation5 + $0x78] sm:$0xff] }
  0x3d   :  { %2215 = vmatmul.mubr.f32.vlgmr.msra.gmra.mrb[0].mxu1 %v146_v26  ;;  %v563_v58 = vsel %vm62_vm1, %v562_v46, %v40_v48  ;;  %v566_v63 = vrot.slane %v43_v52, 5  ;;  %v1577_v3 = vrot.slane %v1564_v55, 6  ;;  %v2495_v11 = vpack.c.bf16 %v162_v35, %v155_v34  ;;  %v2944_v34 = vld [vmem:[#allocation5 + $0x60] sm:$0xff]  ;;  %v1569_v26 = vld [vmem:[#allocation5 + $0x70] sm:$0xff] }
  0x3e   :  { %2478 = vmatpush3.bf16.msra.mxu1 %v2477_v19  ;;  %v1149_v32 = vand.u32 4294901760, %v1148_v28  ;;  %2225 = vmatprep.mubr.msk.f32.mxu1 %vm2748_vm0, %v2749_v1  ;;  %v565_v5 = vsel %vm65_vm2, %v564_v53, %v563_v58  ;;  %v1576_v6 = vsel %vm62_vm1, %v1575_v56, %v1562_v59  ;;  %v1579_v12 = vrot.slane %v1565_v2, 5 }
  0x3f   :  { %2479 = vmatprep.subr.bf16.mxu1 %v2747_v0  ;;  %v567_v15 = vsel %vm68_vm3, %v566_v63, %v565_v5  ;;  %v1578_v19 = vsel %vm65_vm2, %v1577_v3, %v1576_v6  ;;  %v2567_v17 = vpack.c.bf16 %v1165_v57, %v1158_v49  ;;  %v2498_v18 = vpack.c.bf16 %v176_v61, %v169_v60 }
  0x40   :  { %2347 = vmatmul.mubr.f32.vlgmr.msra.gmra.mrb[0].mxu0 %v1149_v32  ;;  %v571_v35 = vand.u32 4294901760, %v44_v13  ;;  %v574_v24 = vand.u32 4294901760, %v45_v14  ;;  %v1580_v22 = vsel %vm68_vm3, %v1579_v12, %v1578_v19  ;;  %v1584_v38 = vand.u32 4294901760, %v2944_v34 }
  0x41   :  { %2550 = vmatpush3.bf16.msra.mxu0 %v2549_v29  ;;  %2357 = vmatprep.mubr.msk.f32.mxu0 %vm2748_vm0, %v2749_v1  ;;  %v2570_v49 = vpack.c.bf16 %v1179_v9, %v1172_v7  ;;  %v1587_v57 = vand.u32 4294901760, %v1568_v25  ;;  %v1581_v61 = vsel %vm70_vm4, %v1580_v22, 0  ;;  %v580_v50 = vand.u32 4294901760, %v47_v37 }
  0x42   :  { %2551 = vmatprep.subr.bf16.mxu0 %v2747_v0  ;;  %2481 = vmatpush3.bf16.msra.mxu1 %v2480_v33  ;;  %v2971_v7 = vsub.f32 %v2944_v34, %v1584_v38  ;;  %v2973_v9 = vand.u32 4294901760, %v1581_v61  ;;  %v1590_v29 = vand.u32 4294901760, %v1569_v26  ;;  %v1593_v30 = vand.u32 4294901760, %v1570_v51 }
  0x43   :  { %2482 = vmatprep.subr.bf16.mxu1 %v2747_v0  ;;  %v2976_v28 = vsub.f32 %v1568_v25, %v1587_v57  ;;  %v2985_v33 = vsub.f32 %v47_v37, %v580_v50  ;;  %v3019_v53 = vpack.c.bf16 %v1587_v57, %v1584_v38 }
  0x44   :  { %v3002_v43 = vsub.f32 %v1569_v26, %v1590_v29  ;;  %v3049_v6 = vpack.c.bf16 %v1593_v30, %v1590_v29 }
  0x45   :  { %2553 = vmatpush3.bf16.msra.mxu0 %v2552_v36  ;;  %2226 = vmatmul.mubr.f32.vlgmr.msra.gmra.mrb[0].mxu1 %v2842_v54  ;;  %v1672_v46 = vand.u32 4294901760, %v2976_v28  ;;  %v673_v52 = vand.u32 4294901760, %v2985_v33  ;;  %v2591_v37 = vpack.c.bf16 %v2976_v28, %v2971_v7 }
  0x46   :  { %2554 = vmatprep.subr.bf16.mxu0 %v2747_v0  ;;  %2484 = vmatpush3.bf16.msra.mxu1 %v2483_v40  ;;  %v1679_v63 = vand.u32 4294901760, %v3002_v43 }
  0x47   :  { %2485 = vmatprep.subr.bf16.mxu1 %v2747_v0  ;;  %2236 = vmatprep.mubr.msk.f32.mxu1 %vm2748_vm0, %v2749_v1  ;;  %v1673_v59 = vsub.f32 %v2976_v28, %v1672_v46  ;;  %v674_v5 = vsub.f32 %v2985_v33, %v673_v52 }
  0x48   :  { %2358 = vmatmul.mubr.f32.vlgmr.msra.gmra.mrb[0].mxu0 %v2859_v4 }
  0x49   :  { %2556 = vmatpush3.bf16.msra.mxu0 %v2555_v41  ;;  %2368 = vmatprep.mubr.msk.f32.mxu0 %vm2748_vm0, %v2749_v1  ;;  %v2993_v41 = vpack.c.bf16 %v574_v24, %v571_v35 }
  0x4a   :  { %2557 = vmatprep.subr.bf16.mxu0 %v2747_v0  ;;  %2487 = vmatpush3.bf16.msra.mxu1 %v2486_v42  ;;  %v2996_v42 = vsub.f32 %v1581_v61, %v2973_v9 }
  0x4b   :  { %2488 = vmatprep.subr.bf16.mxu1 %v2747_v0 }
  0x4d   :  { %2559 = vmatpush3.bf16.msra.mxu0 %v2558_v44  ;;  %2237 = vmatmul.mubr.f32.vlgmr.msra.gmra.mrb[0].mxu1 %v2853_v62  ;;  %v568_v62 = vsel %vm70_vm4, %v567_v15, 0  ;;  %v3004_v44 = vsub.f32 %v1570_v51, %v1593_v30  ;;  %v1680_v15 = vsub.f32 %v3002_v43, %v1679_v63 }
  0x4e   :  { %2560 = vmatprep.subr.bf16.mxu0 %v2747_v0  ;;  %2490 = vmatpush3.bf16.msra.mxu1 %v2796_v16  ;;  %v2961_v60 = vand.u32 4294901760, %v568_v62 }
  0x4f   :  { %2491 = vmatprep.subr.bf16.mxu1 %v2747_v0  ;;  %2247 = vmatprep.mubr.msk.f32.mxu1 %vm2748_vm0, %v2749_v1  ;;  %v1686_v2 = vand.u32 4294901760, %v3004_v44 }
  0x50   :  { %2369 = vmatmul.mubr.f32.vlgmr.msra.gmra.mrb[0].mxu0 %v2871_v10  ;;  %v2967_v10 = vsub.f32 %v45_v14, %v574_v24  ;;  %v2979_v31 = vsub.f32 %v568_v62, %v2961_v60  ;;  %v1674_v14 = vand.u32 4294901760, %v1673_v59  ;;  %v1681_v24 = vand.u32 4294901760, %v1680_v15 }
  0x51   :  { %2562 = vmatpush3.bf16.msra.mxu0 %v2802_v21  ;;  %2379 = vmatprep.mubr.msk.f32.mxu0 %vm2748_vm0, %v2749_v1 }
  0x52   :  { %2563 = vmatprep.subr.bf16.mxu0 %v2747_v0  ;;  %2493 = vmatpush3.bf16.msra.mxu1 %v2809_v27  ;;  %v659_v40 = vand.u32 4294901760, %v2967_v10  ;;  %v641_v45 = vand.u32 4294901760, %v2979_v31 }
  0x53   :  { %2494 = vmatprep.subr.bf16.mxu1 %v2747_v0 }
  0x54   :  { %v642_v58 = vsub.f32 %v2979_v31, %v641_v45 }
  0x55   :  { %2565 = vmatpush3.bf16.msra.mxu0 %v2820_v39  ;;  %2248 = vmatmul.mubr.f32.vlgmr.msra.gmra.mrb[0].mxu1 %v144_v8  ;;  %v2965_v8 = vsub.f32 %v44_v13, %v571_v35 }
  0x56   :  { %2566 = vmatprep.subr.bf16.mxu0 %v2747_v0  ;;  %2496 = vmatpush3.bf16.msra.mxu1 %v2495_v11  ;;  %v643_v13 = vand.u32 4294901760, %v642_v58 }
  0x57   :  { %2497 = vmatprep.subr.bf16.mxu1 %v2747_v0  ;;  %2258 = vmatprep.mubr.msk.f32.mxu1 %vm2748_vm0, %v2749_v1  ;;  %v652_v36 = vand.u32 4294901760, %v2965_v8 }
  0x58   :  { %2380 = vmatmul.mubr.f32.vlgmr.msra.gmra.mrb[0].mxu0 %v1147_v20  ;;  %v577_v20 = vand.u32 4294901760, %v46_v23 }
  0x59   :  { %2568 = vmatpush3.bf16.msra.mxu0 %v2567_v17  ;;  %2390 = vmatprep.mubr.msk.f32.mxu0 %vm2748_vm0, %v2749_v1  ;;  %v653_v47 = vsub.f32 %v2965_v8, %v652_v36  ;;  %v2531_v57 = vpack.c.bf16 %v659_v40, %v652_v36 }
  0x5a   :  { %2569 = vmatprep.subr.bf16.mxu0 %v2747_v0  ;;  %2499 = vmatpush3.bf16.msra.mxu1 %v2498_v18  ;;  %v2983_v32 = vsub.f32 %v46_v23, %v577_v20  ;;  %v3021_v55 = vpack.c.bf16 %v580_v50, %v577_v20  ;;  %v675_v18 = vand.u32 4294901760, %v674_v5  ;;  %v2519_v23 = vpack.c.bf16 %v2967_v10, %v2965_v8 }
  0x5b   :  { %2500 = vmatprep.subr.bf16.mxu1 %v2747_v0  ;;  %v654_v3 = vand.u32 4294901760, %v653_v47 }
  0x5c   :  { %v666_v48 = vand.u32 4294901760, %v2983_v32  ;;  %v2522_v38 = vpack.c.bf16 %v2985_v33, %v2983_v32 }
  0x5d   :  { %2571 = vmatpush3.bf16.msra.mxu0 %v2570_v49  ;;  %2259 = vmatmul.mubr.f32.vlgmr.msra.gmra.mrb[0].mxu1 %v2842_v54  ;;  %v2594_v49 = vpack.c.bf16 %v3004_v44, %v3002_v43 }
  0x5e   :  { %2572 = vmatprep.subr.bf16.mxu0 %v2747_v0  ;;  %2502 = vmatpush3.bf16.msra.mxu1 %v2796_v16  ;;  %v1665_v16 = vand.u32 4294901760, %v2971_v7  ;;  %v2534_v8 = vpack.c.bf16 %v673_v52, %v666_v48 }
  0x5f   :  { %2503 = vmatprep.subr.bf16.mxu1 %v2747_v0  ;;  %2269 = vmatprep.mubr.msk.f32.mxu1 %vm2748_vm0, %v2749_v1 }
  0x60   :  { %2391 = vmatmul.mubr.f32.vlgmr.msra.gmra.mrb[0].mxu0 %v2859_v4  ;;  %v1666_v56 = vsub.f32 %v2971_v7, %v1665_v16  ;;  %v2603_v61 = vpack.c.bf16 %v1672_v46, %v1665_v16 }
  0x61   :  { %2574 = vmatpush3.bf16.msra.mxu0 %v2802_v21  ;;  %2401 = vmatprep.mubr.msk.f32.mxu0 %vm2748_vm0, %v2749_v1  ;;  %v660_v21 = vsub.f32 %v2967_v10, %v659_v40  ;;  %v2606_v10 = vpack.c.bf16 %v1686_v2, %v1679_v63 }
  0x62   :  { %2575 = vmatprep.subr.bf16.mxu0 %v2747_v0  ;;  %2505 = vmatpush3.bf16.msra.mxu1 %v2809_v27  ;;  %v1654_v27 = vand.u32 4294901760, %v2996_v42  ;;  %v1667_v12 = vand.u32 4294901760, %v1666_v56 }
  0x63   :  { %2506 = vmatprep.subr.bf16.mxu1 %v2747_v0 }
  0x64   :  { %v1655_v11 = vsub.f32 %v2996_v42, %v1654_v27  ;;  %v2585_v35 = vpack.c.bf16 %v1674_v14, %v1667_v12 }
  0x65   :  { %2577 = vmatpush3.bf16.msra.mxu0 %v2820_v39  ;;  %2270 = vmatmul.mubr.f32.vlgmr.msra.gmra.mrb[0].mxu1 %v2842_v54  ;;  %v661_v39 = vand.u32 4294901760, %v660_v21  ;;  %v667_v54 = vsub.f32 %v2983_v32, %v666_v48 }
  0x66   :  { %2578 = vmatprep.subr.bf16.mxu0 %v2747_v0  ;;  %2508 = vmatpush3.bf16.msra.mxu1 %v2993_v41  ;;  %v1656_v34 = vand.u32 4294901760, %v1655_v11 }
  0x67   :  { %2509 = vmatprep.subr.bf16.mxu1 %v2747_v0  ;;  %2280 = vmatprep.mubr.msk.f32.mxu1 %vm2748_vm0, %v2749_v1  ;;  %v2513_v19 = vpack.c.bf16 %v661_v39, %v654_v3  ;;  %v668_v17 = vand.u32 4294901760, %v667_v54 }
  0x68   :  { %2402 = vmatmul.mubr.f32.vlgmr.msra.gmra.mrb[0].mxu0 %v2859_v4  ;;  %v1687_v4 = vsub.f32 %v3004_v44, %v1686_v2 }
  0x69   :  { %2580 = vmatpush3.bf16.msra.mxu0 %v3019_v53  ;;  %2412 = vmatprep.mubr.msk.f32.mxu0 %vm2748_vm0, %v2749_v1  ;;  %v2516_v62 = vpack.c.bf16 %v675_v18, %v668_v17 }
  0x6a   :  { %2581 = vmatprep.subr.bf16.mxu0 %v2747_v0  ;;  %2511 = vmatpush3.bf16.msra.mxu1 %v3021_v55  ;;  %v1688_v25 = vand.u32 4294901760, %v1687_v4 }
  0x6b   :  { %2512 = vmatprep.subr.bf16.mxu1 %v2747_v0 }
  0x6c   :  { %v2588_v22 = vpack.c.bf16 %v1688_v25, %v1681_v24 }
  0x6d   :  { %2583 = vmatpush3.bf16.msra.mxu0 %v3049_v6  ;;  %2281 = vmatmul.mubr.f32.vlgmr.msra.gmra.mrb[0].mxu1 %v643_v13 }
  0x6e   :  { %2584 = vmatprep.subr.bf16.mxu0 %v2747_v0  ;;  %2514 = vmatpush3.bf16.msra.mxu1 %v2513_v19 }
  0x6f   :  { %2515 = vmatprep.subr.bf16.mxu1 %v2747_v0  ;;  %2291 = vmatprep.mubr.msk.f32.mxu1 %vm2748_vm0, %v2749_v1 }
  0x70   :  { %2413 = vmatmul.mubr.f32.vlgmr.msra.gmra.mrb[0].mxu0 %v1656_v34 }
  0x71   :  { %2586 = vmatpush3.bf16.msra.mxu0 %v2585_v35  ;;  %2423 = vmatprep.mubr.msk.f32.mxu0 %vm2748_vm0, %v2749_v1 }
  0x72   :  { %2587 = vmatprep.subr.bf16.mxu0 %v2747_v0  ;;  %2517 = vmatpush3.bf16.msra.mxu1 %v2516_v62 }
  0x73   :  { %2518 = vmatprep.subr.bf16.mxu1 %v2747_v0 }
  0x75   :  { %2589 = vmatpush3.bf16.msra.mxu0 %v2588_v22  ;;  %2292 = vmatmul.mubr.f32.vlgmr.msra.gmra.mrb[0].mxu1 %v2961_v60 }
  0x76   :  { %2590 = vmatprep.subr.bf16.mxu0 %v2747_v0  ;;  %2520 = vmatpush3.bf16.msra.mxu1 %v2519_v23 }
  0x77   :  { %2521 = vmatprep.subr.bf16.mxu1 %v2747_v0  ;;  %2302 = vmatprep.mubr.msk.f32.mxu1 %vm2748_vm0, %v2749_v1 }
  0x78   :  { %2424 = vmatmul.mubr.f32.vlgmr.msra.gmra.mrb[0].mxu0 %v2973_v9 }
  0x79   :  { %2592 = vmatpush3.bf16.msra.mxu0 %v2591_v37  ;;  %2434 = vmatprep.mubr.msk.f32.mxu0 %vm2748_vm0, %v2749_v1 }
  0x7a   :  { %2593 = vmatprep.subr.bf16.mxu0 %v2747_v0  ;;  %2523 = vmatpush3.bf16.msra.mxu1 %v2522_v38 }
  0x7b   :  { %2524 = vmatprep.subr.bf16.mxu1 %v2747_v0 }
  0x7d   :  { %2595 = vmatpush3.bf16.msra.mxu0 %v2594_v49  ;;  %2303 = vmatmul.mubr.f32.vlgmr.msra.gmra.mrb[0].mxu1 %v2979_v31 }
  0x7e   :  { %2596 = vmatprep.subr.bf16.mxu0 %v2747_v0  ;;  %2526 = vmatpush3.bf16.msra.mxu1 %v2993_v41 }
  0x7f   :  { %2527 = vmatprep.subr.bf16.mxu1 %v2747_v0  ;;  %2313 = vmatprep.mubr.msk.f32.mxu1 %vm2748_vm0, %v2749_v1 }
  0x80   :  { %2435 = vmatmul.mubr.f32.vlgmr.msra.gmra.mrb[0].mxu0 %v2996_v42 }
  0x81   :  { %2598 = vmatpush3.bf16.msra.mxu0 %v3019_v53  ;;  %2445 = vmatprep.mubr.msk.f32.mxu0 %vm2748_vm0, %v2749_v1 }
  0x82   :  { %2599 = vmatprep.subr.bf16.mxu0 %v2747_v0  ;;  %2529 = vmatpush3.bf16.msra.mxu1 %v3021_v55 }
  0x83   :  { %2530 = vmatprep.subr.bf16.mxu1 %v2747_v0 }
  0x85   :  { %2601 = vmatpush3.bf16.msra.mxu0 %v3049_v6  ;;  %2314 = vmatmul.mubr.f32.vlgmr.msra.gmra.mrb[0].mxu1 %v641_v45 }
  0x86   :  { %2602 = vmatprep.subr.bf16.mxu0 %v2747_v0  ;;  %2532 = vmatpush3.bf16.msra.mxu1 %v2531_v57 }
  0x87   :  { %2533 = vmatprep.subr.bf16.mxu1 %v2747_v0  ;;  %2324 = vmatprep.mubr.msk.f32.mxu1 %vm2748_vm0, %v2749_v1 }
  0x88   :  { %2446 = vmatmul.mubr.f32.vlgmr.msra.gmra.mrb[0].mxu0 %v1654_v27 }
  0x89   :  { %2604 = vmatpush3.bf16.msra.mxu0 %v2603_v61  ;;  %2456 = vmatprep.mubr.msk.f32.mxu0 %vm2748_vm0, %v2749_v1 }
  0x8a   :  { %2605 = vmatprep.subr.bf16.mxu0 %v2747_v0  ;;  %2535 = vmatpush3.bf16.msra.mxu1 %v2534_v8 }
  0x8b   :  { %2536 = vmatprep.subr.bf16.mxu1 %v2747_v0 }
  0x8d   :  { %2607 = vmatpush3.bf16.msra.mxu0 %v2606_v10  ;;  %2325 = vmatmul.mubr.f32.vlgmr.msra.gmra.mrb[0].mxu1 %v2961_v60 }
  0x8e   :  { %2608 = vmatprep.subr.bf16.mxu0 %v2747_v0  ;;  %2538 = vmatpush3.bf16.msra.mxu1 %v2993_v41 }
  0x8f   :  { %2539 = vmatprep.subr.bf16.mxu1 %v2747_v0  ;;  %2335 = vmatprep.mubr.msk.f32.mxu1 %vm2748_vm0, %v2749_v1 }
  0x90   :  { %2457 = vmatmul.mubr.f32.vlgmr.msra.gmra.mrb[0].mxu0 %v2973_v9 }
  0x91   :  { %2610 = vmatpush3.bf16.msra.mxu0 %v3019_v53  ;;  %2467 = vmatprep.mubr.msk.f32.mxu0 %vm2748_vm0, %v2749_v1 }
  0x92   :  { %2611 = vmatprep.subr.bf16.mxu0 %v2747_v0  ;;  %2541 = vmatpush3.bf16.msra.mxu1 %v3021_v55 }
  0x95   :  { %2613 = vmatpush3.bf16.msra.mxu0 %v3049_v6  ;;  %2336 = vmatmul.mubr.f32.vlgmr.msra.gmra.mrb[0].mxu1 %v2961_v60 }
  0x98   :  { %2468 = vmatmul.mubr.f32.vlgmr.msra.gmra.mrb[0].mxu0 %v2973_v9 }
 0x168   :  { %v1051_v20 = vpop.f32.mrb[0].mxu1 }
 0x169   :  { %v2337_v50 = vpop.f32.mrb[1].mxu1 }
 0x16b   :  { %v2064_v26 = vpop.f32.mrb[0].mxu0 }
 0x16c   :  { %v2614_v51 = vadd.f32 %v2064_v26, %v1051_v20  ;;  %v2469_v7 = vpop.f32.mrb[1].mxu0 }
 0x16e   :  { %2069 = vst [vmem:[#allocation7] sm:$0xf] %v2614_v51 }
 0x16f   :  { %2724 = shalt.err (!%p2721_p6)
}
 0x170   :  { %s2725_s12 = scalar_lea.hbm %s3164_s2, 64 }
 0x171   :  { %p2726_p7 = scmp.ne.s32.totalorder %s3164_s2, %s2725_s12  ;;  %p2729_p8 = scmp.lt.u32.totalorder %s2725_s12, %s3164_s2 }
 0x173   :  { %p2731_p9 = pnand %p2729_p8, %p2726_p7 }
 0x175   :  { %2734 = shalt.err (!%p2731_p9)
}
 0x176   :  { %2079 = dma.vmem_to_hbm [thread:$0]  %s2077_s8, 64, %s3164_s2, [#allocation4]  }
 0x177   :  { %2739 = dma.done.wait [#allocation4], 64  }
 0x178   :  { %2740 = vsyncadd [#allocation4], 4294967232 }
 0x179   :  { %2083 = vsyncpa [#allocation3], 1 }
 0x17a   :  { %2084 = vsyncpa [#allocation6], 1 }
 0x17b   :  { %2085 = vsyncpa [#allocation4], 1 }

</bundles_post_ra>
